<compile_context>
chip_gen: v5e
topology: v5e:2x2
jax: 0.10.0
libtpu: 0.0.40
codegen_flags: <defaults>
</compile_context>

<pallas_src>
import math

import jax
import jax.numpy as jnp
from jax.experimental import pallas as pl
from jax.experimental.pallas import tpu as pltpu

_GELU_C = math.sqrt(2.0 / math.pi)


def mlp_kernel(x_ref, w1_ref, b1_ref, w2_ref, b2_ref, o_ref, acc_ref):
    # x_ref:  (TM, Cin)    w1_ref: (Cin, TH)   b1_ref: (1, TH)
    # w2_ref: (TH, Cout)   b2_ref: (1, Cout)
    # o_ref:  (TM, Cout)   acc_ref: (TM, Cout) f32 scratch (fc2 partial sums)
    k = pl.program_id(1)

    @pl.when(k == 0)
    def _init():
        acc_ref[...] = jnp.zeros_like(acc_ref)

    # fc1 for this H-chunk: native-dtype operands on the MXU, f32 accumulation.
    h = jnp.dot(x_ref[...], w1_ref[...], preferred_element_type=jnp.float32)
    h = h + b1_ref[...].astype(jnp.float32)

    # GELU — tanh approximation, matching the module's custom GELU exactly.
    h = 0.5 * h * (1.0 + jnp.tanh(_GELU_C * (h + 0.044715 * (h * h * h))))

    # drop1: Dropout(p=0.0) -> identity (eval semantics)

    # fc2 partial sum over this H-chunk; keep h in the weights' dtype so the
    # MXU runs at native (e.g. bf16) rate; accumulation stays f32 in scratch.
    acc_ref[...] += jnp.dot(h.astype(w2_ref.dtype), w2_ref[...],
                            preferred_element_type=jnp.float32)

    @pl.when(k == pl.num_programs(1) - 1)
    def _finalize():
        o_ref[...] = (acc_ref[...]
                      + b2_ref[...].astype(jnp.float32)).astype(o_ref.dtype)

    # drop2: Dropout(p=0.0) -> identity


def _round_up(x, m):
    return ((x + m - 1) // m) * m


def _pick_hidden_chunk(h, target):
    """Largest multiple of 128 (<= target) that divides h; else the whole h."""
    if h <= target:
        return h
    c = (target // 128) * 128
    while c >= 128:
        if h % c == 0:
            return c
        c -= 128
    return h


def _nbytes(shape, dtype):
    return math.prod(shape) * jnp.dtype(dtype).itemsize


def mlp_forward(x, w1, b1, w2, b2, *, tile_m=512, tile_h=512):
    """x: [B, N, Cin]; w1: [Cin, H]; b1: [H]; w2: [H, Cout]; b2: [Cout]."""
    B, N, Cin = x.shape
    H = w1.shape[1]
    Cout = w2.shape[1]
    M = B * N

    x2d = x.reshape(M, Cin)          # free reshape, no HBM copy
    b1_2d = b1.reshape(1, H)
    b2_2d = b2.reshape(1, Cout)

    # Row tile: as large as requested but no bigger than needed; multiple of 8
    # sublanes.  Ragged last row tile is masked by Pallas (no host pad/slice).
    tm = min(tile_m, _round_up(M, 8))
    grid_m = pl.cdiv(M, tm)

    # Hidden-dim chunk (reduction axis of fc2): must divide H exactly so the
    # fc2 accumulation never sees padded K-columns.
    th = _pick_hidden_chunk(H, tile_h)
    grid_k = H // th

    # VMEM budget: double-buffered in/out tiles + f32 accumulator + h temp.
    est = (2 * (_nbytes((tm, Cin), x.dtype)
                + _nbytes((Cin, th), w1.dtype)
                + _nbytes((1, th), b1.dtype)
                + _nbytes((th, Cout), w2.dtype)
                + _nbytes((1, Cout), b2.dtype)
                + _nbytes((tm, Cout), x.dtype))
           + _nbytes((tm, Cout), jnp.float32)
           + _nbytes((tm, th), jnp.float32))
    vmem_limit = int(min(max(2 * est, 32 * 1024 * 1024), 64 * 1024 * 1024))

    itemsize = jnp.dtype(x.dtype).itemsize
    cost = pl.CostEstimate(
        flops=2 * M * Cin * H + 2 * M * H * Cout,
        transcendentals=M * H,
        bytes_accessed=int(x2d.size * x2d.dtype.itemsize
                           + w1.size * w1.dtype.itemsize
                           + b1.size * b1.dtype.itemsize
                           + w2.size * w2.dtype.itemsize
                           + b2.size * b2.dtype.itemsize
                           + M * Cout * itemsize))

    out = pl.pallas_call(
        mlp_kernel,
        out_shape=jax.ShapeDtypeStruct((M, Cout), x.dtype),
        grid_spec=pltpu.PrefetchScalarGridSpec(
            num_scalar_prefetch=0,
            grid=(grid_m, grid_k),
            in_specs=[
                pl.BlockSpec((tm, Cin), lambda i, k: (i, 0)),
                pl.BlockSpec((Cin, th), lambda i, k: (0, k)),
                pl.BlockSpec((1, th), lambda i, k: (0, k)),
                pl.BlockSpec((th, Cout), lambda i, k: (k, 0)),
                pl.BlockSpec((1, Cout), lambda i, k: (0, 0)),
            ],
            out_specs=pl.BlockSpec((tm, Cout), lambda i, k: (i, 0)),
            scratch_shapes=[pltpu.VMEM((tm, Cout), jnp.float32)],
        ),
        compiler_params=pltpu.CompilerParams(
            dimension_semantics=("parallel", "arbitrary"),
            vmem_limit_bytes=vmem_limit,
        ),
        cost_estimate=cost,
    )(x2d, w1, b1_2d, w2, b2_2d)

    return out.reshape(B, N, Cout)


def _ref_mlp(x, w1, b1, w2, b2):
    h = jnp.einsum("bnc,ch->bnh", x.astype(jnp.float32), w1.astype(jnp.float32)) + b1
    c = math.sqrt(2.0 / math.pi)
    h = 0.5 * h * (1.0 + jnp.tanh(c * (h + 0.044715 * h ** 3)))
    y = jnp.einsum("bnh,ho->bno", h, w2.astype(jnp.float32)) + b2
    return y.astype(x.dtype)


if __name__ == "__main__":
    B, N = 2, 8
    in_features = 32
    hidden_features = 64
    out_features = 32

    key = jax.random.PRNGKey(0)
    kx, k1, kb1, k2, kb2 = jax.random.split(key, 5)

    x = jax.random.normal(kx, (B, N, in_features), dtype=jnp.float32)

    # Deterministic init mimicking nn.Linear (uniform in +/- 1/sqrt(fan_in)).
    # nn.Linear stores weight as (out, in); we keep (in, out) for the kernel.
    lim1 = 1.0 / math.sqrt(in_features)
    w1 = jax.random.uniform(k1, (in_features, hidden_features),
                            minval=-lim1, maxval=lim1, dtype=jnp.float32)
    b1 = jax.random.uniform(kb1, (hidden_features,),
                            minval=-lim1, maxval=lim1, dtype=jnp.float32)
    lim2 = 1.0 / math.sqrt(hidden_features)
    w2 = jax.random.uniform(k2, (hidden_features, out_features),
                            minval=-lim2, maxval=lim2, dtype=jnp.float32)
    b2 = jax.random.uniform(kb2, (out_features,),
                            minval=-lim2, maxval=lim2, dtype=jnp.float32)

    y = mlp_forward(x, w1, b1, w2, b2)
    y = jax.block_until_ready(y)

    y_ref = _ref_mlp(x, w1, b1, w2, b2)
    assert y.shape == (B, N, out_features)
    assert jnp.allclose(y, y_ref, atol=1e-5, rtol=1e-5), "mismatch vs reference"

    print("KERNEL_OK")
</pallas_src>

<mosaic_0001>
module attributes {stable_mosaic.version = 11 : i64} {
  func.func @mlp_kernel(%arg0: i32, %arg1: i32, %arg2: memref<16x32xf32, #tpu.memory_space<vmem>>, %arg3: memref<32x64xf32, #tpu.memory_space<vmem>>, %arg4: memref<1x64xf32, #tpu.memory_space<vmem>>, %arg5: memref<64x32xf32, #tpu.memory_space<vmem>>, %arg6: memref<1x32xf32, #tpu.memory_space<vmem>>, %arg7: memref<16x32xf32, #tpu.memory_space<vmem>>, %arg8: memref<16x32xf32, #tpu.memory_space<vmem>>) attributes {dimension_semantics = [#tpu.dimension_semantics<parallel>, #tpu.dimension_semantics<arbitrary>], iteration_bounds = array<i64: 1, 1>, scalar_prefetch = 0 : i64, scratch_operands = 1 : i64, tpu.core_type = #tpu.core_type<tc>, window_params = [{transform_indices = @transform_0, window_bounds = array<i64: 16, 32>}, {transform_indices = @transform_1, window_bounds = array<i64: 32, 64>}, {transform_indices = @transform_2, window_bounds = array<i64: 1, 64>}, {transform_indices = @transform_3, window_bounds = array<i64: 64, 32>}, {pipeline_mode = #tpu.pipeline_mode<synchronous>, transform_indices = @transform_4, window_bounds = array<i64: 1, 32>}, {transform_indices = @transform_5, window_bounds = array<i64: 16, 32>}]} {
    %c0_i32 = arith.constant 0 : i32
    %0 = arith.cmpi eq, %arg1, %c0_i32 : i32
    %1 = arith.extui %0 : i1 to i32
    %c0_i32_0 = arith.constant 0 : i32
    %2 = arith.cmpi ne, %1, %c0_i32_0 : i32
    scf.if %2 {
      %cst_19 = arith.constant 0.000000e+00 : f32
      %30 = vector.broadcast %cst_19 : f32 to vector<16x32xf32>
      %c0_20 = arith.constant 0 : index
      %c0_21 = arith.constant 0 : index
      %31 = vector.load %arg8[%c0_20, %c0_21] : memref<16x32xf32, #tpu.memory_space<vmem>>, vector<16x32xf32>
      tpu.vector_store %arg8[%c0_20, %c0_21], %30 {strides = array<i32>} : memref<16x32xf32, #tpu.memory_space<vmem>>, vector<16x32xf32>,
    } else {
    }
    %c0 = arith.constant 0 : index
    %c0_1 = arith.constant 0 : index
    %3 = vector.load %arg2[%c0, %c0_1] : memref<16x32xf32, #tpu.memory_space<vmem>>, vector<16x32xf32>
    %c0_2 = arith.constant 0 : index
    %c0_3 = arith.constant 0 : index
    %4 = vector.load %arg3[%c0_2, %c0_3] : memref<32x64xf32, #tpu.memory_space<vmem>>, vector<32x64xf32>
    %cst = arith.constant dense<0.000000e+00> : vector<16x64xf32>
    %5 = tpu.matmul %3, %4, %cst {dimension_numbers = #tpu.dot_dimension_numbers<[1], [0], [0], [1], [0, 0, 1, 1], [], []>} : vector<16x32xf32>, vector<32x64xf32>, vector<16x64xf32> -> vector<16x64xf32>
    %c0_4 = arith.constant 0 : index
    %c0_5 = arith.constant 0 : index
    %6 = vector.load %arg4[%c0_4, %c0_5] : memref<1x64xf32, #tpu.memory_space<vmem>>, vector<1x64xf32>
    %7 = vector.broadcast %6 : vector<1x64xf32> to vector<16x64xf32>
    %8 = arith.addf %5, %7 : vector<16x64xf32>
    %cst_6 = arith.constant 5.000000e-01 : f32
    %9 = vector.broadcast %cst_6 : f32 to vector<16x64xf32>
    %10 = arith.mulf %9, %8 : vector<16x64xf32>
    %11 = arith.mulf %8, %8 : vector<16x64xf32>
    %12 = arith.mulf %11, %8 : vector<16x64xf32>
    %cst_7 = arith.constant 4.471500e-02 : f32
    %13 = vector.broadcast %cst_7 : f32 to vector<16x64xf32>
    %14 = arith.mulf %13, %12 : vector<16x64xf32>
    %15 = arith.addf %8, %14 : vector<16x64xf32>
    %cst_8 = arith.constant 0.797884583 : f32
    %16 = vector.broadcast %cst_8 : f32 to vector<16x64xf32>
    %17 = arith.mulf %16, %15 : vector<16x64xf32>
    %18 = math.tanh %17 : vector<16x64xf32>
    %cst_9 = arith.constant 1.000000e+00 : f32
    %19 = vector.broadcast %cst_9 : f32 to vector<16x64xf32>
    %20 = arith.addf %19, %18 : vector<16x64xf32>
    %21 = arith.mulf %10, %20 : vector<16x64xf32>
    %c0_10 = arith.constant 0 : index
    %c0_11 = arith.constant 0 : index
    %22 = vector.load %arg8[%c0_10, %c0_11] : memref<16x32xf32, #tpu.memory_space<vmem>>, vector<16x32xf32>
    %c0_12 = arith.constant 0 : index
    %c0_13 = arith.constant 0 : index
    %23 = vector.load %arg5[%c0_12, %c0_13] : memref<64x32xf32, #tpu.memory_space<vmem>>, vector<64x32xf32>
    %cst_14 = arith.constant dense<0.000000e+00> : vector<16x32xf32>
    %24 = tpu.matmul %21, %23, %cst_14 {dimension_numbers = #tpu.dot_dimension_numbers<[1], [0], [0], [1], [0, 0, 1, 1], [], []>} : vector<16x64xf32>, vector<64x32xf32>, vector<16x32xf32> -> vector<16x32xf32>
    %25 = arith.addf %22, %24 : vector<16x32xf32>
    %c0_15 = arith.constant 0 : index
    %c0_16 = arith.constant 0 : index
    %26 = vector.load %arg8[%c0_15, %c0_16] : memref<16x32xf32, #tpu.memory_space<vmem>>, vector<16x32xf32>
    tpu.vector_store %arg8[%c0_15, %c0_16], %25 {strides = array<i32>} : memref<16x32xf32, #tpu.memory_space<vmem>>, vector<16x32xf32>,
    %c0_i32_17 = arith.constant 0 : i32
    %27 = arith.cmpi eq, %arg1, %c0_i32_17 : i32
    %28 = arith.extui %27 : i1 to i32
    %c0_i32_18 = arith.constant 0 : i32
    %29 = arith.cmpi ne, %28, %c0_i32_18 : i32
    scf.if %29 {
      %c0_19 = arith.constant 0 : index
      %c0_20 = arith.constant 0 : index
      %30 = vector.load %arg8[%c0_19, %c0_20] : memref<16x32xf32, #tpu.memory_space<vmem>>, vector<16x32xf32>
      %c0_21 = arith.constant 0 : index
      %c0_22 = arith.constant 0 : index
      %31 = vector.load %arg6[%c0_21, %c0_22] : memref<1x32xf32, #tpu.memory_space<vmem>>, vector<1x32xf32>
      %32 = vector.broadcast %31 : vector<1x32xf32> to vector<16x32xf32>
      %33 = arith.addf %30, %32 : vector<16x32xf32>
      %c0_23 = arith.constant 0 : index
      %c0_24 = arith.constant 0 : index
      %34 = vector.load %arg7[%c0_23, %c0_24] : memref<16x32xf32, #tpu.memory_space<vmem>>, vector<16x32xf32>
      tpu.vector_store %arg7[%c0_23, %c0_24], %33 {strides = array<i32>} : memref<16x32xf32, #tpu.memory_space<vmem>>, vector<16x32xf32>,
    } else {
    }
    return
  }
  func.func @transform_0(%arg0: i32, %arg1: i32) -> (i32, i32) {
    %c0_i32 = arith.constant 0 : i32
    %c0_i32_0 = arith.constant 0 : i32
    return %arg0, %c0_i32 : i32, i32
  }
  func.func @transform_1(%arg0: i32, %arg1: i32) -> (i32, i32) {
    %c0_i32 = arith.constant 0 : i32
    %c0_i32_0 = arith.constant 0 : i32
    return %c0_i32, %arg1 : i32, i32
  }
  func.func @transform_2(%arg0: i32, %arg1: i32) -> (i32, i32) {
    %c0_i32 = arith.constant 0 : i32
    %c0_i32_0 = arith.constant 0 : i32
    return %c0_i32, %arg1 : i32, i32
  }
  func.func @transform_3(%arg0: i32, %arg1: i32) -> (i32, i32) {
    %c0_i32 = arith.constant 0 : i32
    %c0_i32_0 = arith.constant 0 : i32
    return %arg1, %c0_i32 : i32, i32
  }
  func.func @transform_4(%arg0: i32, %arg1: i32) -> (i32, i32) {
    %c0_i32 = arith.constant 0 : i32
    %c0_i32_0 = arith.constant 0 : i32
    %c0_i32_1 = arith.constant 0 : i32
    return %c0_i32, %c0_i32_0 : i32, i32
  }
  func.func @transform_5(%arg0: i32, %arg1: i32) -> (i32, i32) {
    %c0_i32 = arith.constant 0 : i32
    %c0_i32_0 = arith.constant 0 : i32
    return %arg0, %c0_i32 : i32, i32
  }
}

</mosaic_0001>

<bundles_post_ra>
// kernel: tpu_custom_call.1
= control target key start
LH: loop header
LB: loop body
LE: loop exit
PB: predicated region body
PF: predicated region fallthrough
CT: control target
= control target key end

     0   :  { %s306_s0 = inlined_call_operand.vmem [shape: f32[16,32], index: 0, kind: input, shape index: {}]   ;;  %s307_s1 = inlined_call_operand.vmem [shape: f32[32,64], index: 1, kind: input, shape index: {}]   ;;  %s308_s2 = inlined_call_operand.vmem [shape: f32[1,64], index: 2, kind: input, shape index: {}]   ;;  %s309_s3 = inlined_call_operand.vmem [shape: f32[64,32], index: 3, kind: input, shape index: {}]   ;;  %s310_s4 = inlined_call_operand.vmem [shape: f32[1,32], index: 4, kind: input, shape index: {}]   ;;  %s311_s5 = inlined_call_operand.hbm [shape: f32[16,32], index: 5, kind: output, shape index: {}]  }
   0x1   :  { %v33_v0 = vld [vmem:[%s307_s1 + $0x18] sm:$0xff]  ;;  %v32_v1 = vld [vmem:[%s307_s1 + $0x10] sm:$0xff]  ;;  %v31_v2 = vld [vmem:[%s307_s1 + $0x8] sm:$0xff] }
   0x2   :  { %57 = vmatpush.msra.mxu0 %v33_v0  ;;  %165 = vmatpush.msra.mxu3 %v33_v0 }
   0x3   :  { %10 = vsyncpa [#allocation4], 0  ;;  %v30_v3 = vld [vmem:[%s307_s1] sm:$0xff]  ;;  %vm25_vm0 = vcmask 261120   ;;  %v29_v5 = vld [vmem:[%s306_s0 + $0x8] sm:$0xff]  ;;  %v213_v15 = vmov 0.0  }
   0x4   :  { %58 = vmatpush.msra.mxu0 %v32_v1  ;;  %166 = vmatpush.msra.mxu3 %v32_v1  ;;  %v28_v4 = vld [vmem:[%s306_s0] sm:$0xff]  ;;  %v95_v6 = vld [vmem:[%s309_s3 + $0x38] sm:$0xff]  ;;  %v94_v7 = vld [vmem:[%s309_s3 + $0x30] sm:$0xff]  ;;  %26 = vst.msk [vmem:[#allocation2] sm:$0xff] %vm25_vm0, %v213_v15  ;;  %vm96_vm1 = vcmask 523264   ;;  %s214_s21 = smov [#allocation3]  }
   0x5   :  { %111 = vmatpush.msra.mxu1 %v95_v6  ;;  %169 = vmatpush.msra.mxu2 %v95_v6  ;;  %v93_v8 = vld [vmem:[%s309_s3 + $0x28] sm:$0xff]  ;;  %v92_v9 = vld [vmem:[%s309_s3 + $0x20] sm:$0xff]  ;;  %v91_v10 = vld [vmem:[%s309_s3 + $0x18] sm:$0xff]  ;;  %27 = vst.msk [vmem:[#allocation2 + $0x8] sm:$0xff] %vm25_vm0, %v213_v15  ;;  %s147_s22 = sshll.u32 %s214_s21, 4  ;;  %s149_s25 = sshll.u32 %s311_s5, 4  ;;  %s148_s22 = int_to_ptr.vmem [resolvable:$true] %s147_s22  ;;  %s150_s25 = int_to_ptr.hbm [resolvable:$true] %s149_s25 }
   0x6   :  { %59 = vmatpush.msra.mxu0 %v31_v2  ;;  %167 = vmatpush.msra.mxu3 %v31_v2  ;;  %v90_v11 = vld [vmem:[%s309_s3 + $0x10] sm:$0xff]  ;;  %v89_v12 = vld [vmem:[%s309_s3 + $0x8] sm:$0xff]  ;;  %v88_v13 = vld [vmem:[%s309_s3] sm:$0xff]  ;;  %s216_s26 = smov 8  }
   0x7   :  { %112 = vmatpush.msra.mxu1 %v94_v7  ;;  %170 = vmatpush.msra.mxu2 %v94_v7  ;;  %v181_v14 = vld [vmem:[%s308_s2] ss:$0 sm:$0xff] }
   0x8   :  { %60 = vmatpush.msra.mxu0 %v30_v3  ;;  %168 = vmatpush.msra.mxu3 %v30_v3  ;;  %v182_v41 = vld [vmem:[%s310_s4] ss:$0 sm:$0xff]  ;;  %s215_s4 = smov 128  }
   0x9   :  { %161 = vmatmul.msk.f32.vlgmr.msra.gmra.mxu0 %vm25_vm0, %v28_v4  ;;  %162 = vmatmul.msk.f32.vlgmr.msra.gmra.mxu3 %vm25_vm0, %v29_v5 }
   0xa   :  { %113 = vmatpush.msra.mxu1 %v93_v8  ;;  %171 = vmatpush.msra.mxu2 %v93_v8 }
   0xb   :  { %v86_v38 = vld [vmem:[#allocation2] sm:$0xff] }
   0xc   :  { %114 = vmatpush.msra.mxu1 %v92_v9  ;;  %172 = vmatpush.msra.mxu2 %v92_v9  ;;  %v87_v42 = vld [vmem:[#allocation2 + $0x8] sm:$0xff] }
   0xe   :  { %115 = vmatpush.msra.mxu1 %v91_v10  ;;  %173 = vmatpush.msra.mxu2 %v91_v10 }
  0x10   :  { %116 = vmatpush.msra.mxu1 %v90_v11  ;;  %174 = vmatpush.msra.mxu2 %v90_v11 }
  0x12   :  { %117 = vmatpush.msra.mxu1 %v89_v12  ;;  %175 = vmatpush.msra.mxu2 %v89_v12 }
  0x14   :  { %118 = vmatpush.msra.mxu1 %v88_v13  ;;  %176 = vmatpush.msra.mxu2 %v88_v13 }
  0x86   :  { %v62_v16 = vpop.f32.mrf.mxu0 }
  0x87   :  { %v63_v17 = vadd.f32 %v181_v14, %v62_v16 }
  0x89   :  { %v70_v18 = vmul.f32 %v63_v17, %v63_v17  ;;  %v68_v31 = vmul.f32 0.5, %v63_v17 }
  0x8b   :  { %v72_v19 = vmul.f32 %v70_v18, %v63_v17 }
  0x8c   :  { %v65_v20 = vpop.f32.mrf.mxu3 }
  0x8d   :  { %v74_v21 = vmul.f32 0.044715, %v72_v19  ;;  %v66_v22 = vadd.f32 %v181_v14, %v65_v20 }
  0x8f   :  { %v76_v23 = vadd.f32 %v74_v21, %v63_v17  ;;  %v71_v24 = vmul.f32 %v66_v22, %v66_v22  ;;  %v69_v35 = vmul.f32 0.5, %v66_v22 }
  0x91   :  { %v73_v25 = vmul.f32 %v71_v24, %v66_v22  ;;  %v78_v26 = vmul.f32 0.7978846, %v76_v23 }
  0x93   :  { %v75_v27 = vmul.f32 0.044715, %v73_v25  ;;  %183 = vtanh.f32 %v78_v26 }
  0x95   :  { %v77_v28 = vadd.f32 %v75_v27, %v66_v22 }
  0x97   :  { %v79_v29 = vmul.f32 0.7978846, %v77_v28 }
  0x99   :  { %v184_v30 = vpop.eup %183  ;;  %185 = vtanh.f32 %v79_v29 }
  0x9a   :  { %v82_v32 = vadd.f32 1.0, %v184_v30 }
  0x9c   :  { %v84_v33 = vmul.f32 %v82_v32, %v68_v31 }
  0x9e   :  { %163 = vmatmul.msk.f32.vlgmr.msra.gmra.mxu1 %vm96_vm1, %v84_v33 }
  0x9f   :  { %v186_v34 = vpop.eup %185 }
  0xa0   :  { %v83_v36 = vadd.f32 1.0, %v186_v34 }
  0xa2   :  { %v85_v37 = vmul.f32 %v83_v36, %v69_v35 }
  0xa4   :  { %164 = vmatmul.msk.f32.vlgmr.msra.gmra.mxu2 %vm96_vm1, %v85_v37 }
 0x11b   :  { %v120_v39 = vpop.f32.mrf.mxu1 }
 0x11c   :  { %v126_v40 = vadd.f32 %v120_v39, %v86_v38 }
 0x11e   :  { %128 = vst.msk [vmem:[#allocation2] sm:$0xff] %vm25_vm0, %v126_v40 }
 0x125   :  { %v133_v43 = vld [vmem:[#allocation2] sm:$0xff] }
 0x126   :  { %v139_v44 = vadd.f32 %v182_v41, %v133_v43 }
 0x127   :  { %v123_v45 = vpop.f32.mrf.mxu2 }
 0x128   :  { %v127_v46 = vadd.f32 %v123_v45, %v87_v42  ;;  %141 = vst.msk [vmem:[#allocation3] sm:$0xff] %vm25_vm0, %v139_v44 }
 0x12a   :  { %129 = vst.msk [vmem:[#allocation2 + $0x8] sm:$0xff] %vm25_vm0, %v127_v46 }
 0x131   :  { %v134_v47 = vld [vmem:[#allocation2 + $0x8] sm:$0xff] }
 0x132   :  { %v140_v48 = vadd.f32 %v182_v41, %v134_v47 }
 0x134   :  { %142 = vst.msk [vmem:[#allocation3 + $0x8] sm:$0xff] %vm25_vm0, %v140_v48 }
 0x135   :  { %155 = dma.vmem_to_hbm [thread:$0]  %s148_s22, 256, %s150_s25, [#allocation4], %s215_s4, %s215_s4, %s216_s26  }
 0x136   :  { %211 = dma.done.wait [#allocation4], 256  }
 0x137   :  { %212 = vsyncadd [#allocation4], 4294967040 }
 0x138   :  { %160 = vsyncpa [#allocation4], 1 }

</bundles_post_ra>
